<compile_context>
chip_gen: v7x
topology: tpu7x:2x2x1
jax: 0.10.0
libtpu: 0.0.40
codegen_flags: <defaults>
</compile_context>

<pallas_src>
import functools

import jax
import jax.numpy as jnp
from jax.experimental import pallas as pl
from jax.experimental.pallas import tpu as pltpu


def _round_up(x, m):
    return (x + m - 1) // m * m


def _pad2d(a, rows, cols):
    pr = rows - a.shape[0]
    pc = cols - a.shape[1]
    if pr == 0 and pc == 0:
        return a
    return jnp.pad(a, ((0, pr), (0, pc)))


# ----------------------------- kernels --------------------------------------
def _linear_resident_kernel(x_ref, w_ref, b_ref, o_ref):
    # Fast path: whole (K_p, N_p) weight lives in VMEM (constant index_map),
    # grid is over M only -> no accumulator scratch / K phases.
    acc = jnp.dot(x_ref[...], w_ref[...], preferred_element_type=jnp.float32)
    o_ref[...] = (acc + b_ref[...].astype(jnp.float32)).astype(o_ref.dtype)


def _linear_tiled_kernel(x_ref, w_ref, b_ref, o_ref, acc_ref):
    # x_ref: (tm, tk); w_ref: (tk, tn) pre-transposed weight (K, N) so the
    # MXU consumes it directly (no per-step XLU transpose); b_ref: (1, tn).
    k = pl.program_id(2)

    @pl.when(k == 0)
    def _():
        # Seed the accumulator with the broadcast bias; the last-K step is
        # then a pure down-cast.
        acc_ref[...] = jnp.broadcast_to(
            b_ref[...].astype(jnp.float32), acc_ref.shape)

    acc_ref[...] += jnp.dot(x_ref[...], w_ref[...],
                            preferred_element_type=jnp.float32)

    @pl.when(k == pl.num_programs(2) - 1)
    def _():
        o_ref[...] = acc_ref[...].astype(o_ref.dtype)


# ----------------------------- wrapper ---------------------------------------
@functools.partial(
    jax.jit,
    static_argnames=("tm", "tn", "tk", "compute_dtype",
                     "weight_resident_max_bytes"))
def linear_forward(x, weight, bias=None, *, tm=512, tn=512, tk=512,
                   compute_dtype=jnp.bfloat16,
                   weight_resident_max_bytes=8 * 1024 * 1024):
    """y = x @ weight.T + bias over the last axis of x.

    x:      [..., input_size]
    weight: [output_size, input_size]   (PyTorch nn.Linear convention)
    bias:   [output_size] or None
    """
    *lead, k = x.shape
    n, k_w = weight.shape
    assert k_w == k

    out_dtype = x.dtype
    itemsize = jnp.dtype(compute_dtype).itemsize
    out_itemsize = jnp.dtype(out_dtype).itemsize
    sub = 16 if itemsize < 4 else 8      # bf16 packs 16 sublanes per vreg

    # Cast before padding so x / W are only touched once in HBM pre-kernel.
    x2d = x.reshape(-1, k).astype(compute_dtype)
    m = x2d.shape[0]
    w_kn = weight.T.astype(compute_dtype)            # (K, N), transposed once
    if bias is None:
        b_row = jnp.zeros((1, n), jnp.float32)
    else:
        b_row = bias.astype(jnp.float32).reshape(1, n)

    k_p128 = _round_up(k, 128)
    n_p128 = _round_up(n, 128)

    # --------------------- weight-resident fast path -------------------------
    resident_w_bytes = k_p128 * n_p128 * itemsize
    tm_fast = _round_up(max(sub, min(tm, _round_up(m, sub))), sub)
    fast_vmem = (resident_w_bytes
                 + 2 * tm_fast * k_p128 * itemsize     # double-buffered x
                 + 2 * tm_fast * n_p128 * out_itemsize  # double-buffered out
                 + 2 * n_p128 * 4)                      # bias
    use_fast = (weight_resident_max_bytes > 0
                and resident_w_bytes <= weight_resident_max_bytes
                and fast_vmem <= 24 * 1024 * 1024)

    if use_fast:
        tm_f = tm_fast
        m_p = _round_up(m, tm_f)
        x_pad = _pad2d(x2d, m_p, k_p128)
        w_pad = _pad2d(w_kn, k_p128, n_p128)
        b_pad = _pad2d(b_row, 1, n_p128)

        out2d = pl.pallas_call(
            _linear_resident_kernel,
            out_shape=jax.ShapeDtypeStruct((m_p, n_p128), out_dtype),
            grid_spec=pltpu.PrefetchScalarGridSpec(
                num_scalar_prefetch=0,
                grid=(m_p // tm_f,),
                in_specs=[
                    pl.BlockSpec((tm_f, k_p128), lambda i: (i, 0)),
                    pl.BlockSpec((k_p128, n_p128), lambda i: (0, 0)),  # resident
                    pl.BlockSpec((1, n_p128), lambda i: (0, 0)),       # resident
                ],
                out_specs=pl.BlockSpec((tm_f, n_p128), lambda i: (i, 0)),
            ),
            compiler_params=pltpu.CompilerParams(
                dimension_semantics=("parallel",),   # shards M across v7x TCs
                vmem_limit_bytes=min(
                    max(int(fast_vmem * 1.5) + (2 << 20), 16 << 20), 64 << 20),
            ),
            cost_estimate=pl.CostEstimate(
                flops=2 * m_p * n_p128 * k_p128,
                bytes_accessed=(m_p * k_p128 * itemsize
                                + resident_w_bytes
                                + m_p * n_p128 * out_itemsize),
                transcendentals=0),
        )(x_pad, w_pad, b_pad)
        return out2d[:m, :n].reshape(*lead, n)

    # --------------------- general 3-D-grid path -----------------------------
    tm = _round_up(max(sub, min(tm, _round_up(m, sub))), sub)
    tn = _round_up(max(128, min(tn, n_p128)), 128)
    tk = _round_up(max(128, min(tk, k_p128)), 128)

    m_p = _round_up(m, tm)
    n_p = _round_up(n, tn)
    k_p = _round_up(k, tk)

    x_pad = _pad2d(x2d, m_p, k_p)        # K zero-fill is exact for the matmul
    w_pad = _pad2d(w_kn, k_p, n_p)
    b_pad = _pad2d(b_row, 1, n_p)

    grid = (m_p // tm, n_p // tn, k_p // tk)

    vmem_est = (2 * (tm * tk + tk * tn) * itemsize    # double-buffered x, W
                + 2 * tm * tn * out_itemsize          # double-buffered out
                + tm * tn * 4                         # f32 accumulator
                + 2 * tn * 4)                         # bias
    vmem_limit = min(max(int(vmem_est * 1.5) + (2 << 20), 16 << 20), 64 << 20)

    out2d = pl.pallas_call(
        _linear_tiled_kernel,
        out_shape=jax.ShapeDtypeStruct((m_p, n_p), out_dtype),
        grid_spec=pltpu.PrefetchScalarGridSpec(
            num_scalar_prefetch=0,
            grid=grid,
            in_specs=[
                pl.BlockSpec((tm, tk), lambda i, j, kk: (i, kk)),   # x tile
                pl.BlockSpec((tk, tn), lambda i, j, kk: (kk, j)),   # W (K,N) tile
                pl.BlockSpec((1, tn), lambda i, j, kk: (0, j)),     # bias tile
            ],
            out_specs=pl.BlockSpec((tm, tn), lambda i, j, kk: (i, j)),
            scratch_shapes=[pltpu.VMEM((tm, tn), jnp.float32)],
        ),
        compiler_params=pltpu.CompilerParams(
            dimension_semantics=("parallel", "parallel", "arbitrary"),
            vmem_limit_bytes=vmem_limit,
        ),
        cost_estimate=pl.CostEstimate(
            flops=2 * m_p * n_p * k_p,
            bytes_accessed=((m_p * k_p * (n_p // tn)
                             + k_p * n_p * (m_p // tm)) * itemsize
                            + m_p * n_p * out_itemsize),
            transcendentals=0),
    )(x_pad, w_pad, b_pad)

    return out2d[:m, :n].reshape(*lead, n)


if __name__ == "__main__":
    key = jax.random.PRNGKey(0)
    kx, kw, kb, kx2, kw2, kb2, kx3, kw3, kb3 = jax.random.split(key, 9)

    # --- 1) Small NMT-like shapes -> weight-resident fast path (bf16) --------
    batch, seq, input_size, output_size = 2, 8, 32, 64
    x = jax.random.normal(kx, (batch, seq, input_size), dtype=jnp.float32)
    w = jax.random.normal(kw, (output_size, input_size), dtype=jnp.float32) * 0.1
    b = jax.random.normal(kb, (output_size,), dtype=jnp.float32) * 0.1

    y = linear_forward(x, w, b)
    jax.block_until_ready(y)
    y_ref = x @ w.T + b
    assert y.shape == (batch, seq, output_size)
    assert jnp.allclose(y, y_ref, atol=2e-2, rtol=2e-2)

    # --- 2) Non-aligned shapes, general 3-D grid, exact f32 compute ----------
    m2, k2, n2 = 40, 300, 200
    x2 = jax.random.normal(kx2, (m2, k2), dtype=jnp.float32)
    w2 = jax.random.normal(kw2, (n2, k2), dtype=jnp.float32) * 0.05
    b2 = jax.random.normal(kb2, (n2,), dtype=jnp.float32) * 0.05

    y2 = linear_forward(x2, w2, b2, tm=16, tn=128, tk=128,
                        compute_dtype=jnp.float32,
                        weight_resident_max_bytes=0)
    jax.block_until_ready(y2)
    y2_ref = x2 @ w2.T + b2
    assert y2.shape == (m2, n2)
    assert jnp.allclose(y2, y2_ref, atol=1e-4, rtol=1e-4)

    # --- 3) Multi-step M/N/K grid in bf16 (main performance config) ----------
    m3, k3, n3 = 128, 256, 256
    x3 = jax.random.normal(kx3, (m3, k3), dtype=jnp.float32)
    w3 = jax.random.normal(kw3, (n3, k3), dtype=jnp.float32) * 0.05
    b3 = jax.random.normal(kb3, (n3,), dtype=jnp.float32) * 0.05

    y3 = linear_forward(x3, w3, b3, tm=64, tn=128, tk=128,
                        weight_resident_max_bytes=0)
    jax.block_until_ready(y3)
    y3_ref = x3 @ w3.T + b3
    assert y3.shape == (m3, n3)
    assert jnp.allclose(y3, y3_ref, atol=3e-2, rtol=3e-2)

    print("KERNEL_OK")
</pallas_src>

<mosaic_0001>
module attributes {stable_mosaic.version = 11 : i64} {
  func.func @_linear_resident_kernel(%arg0: i32, %arg1: memref<16x128xbf16, #tpu.memory_space<vmem>>, %arg2: memref<128x128xbf16, #tpu.memory_space<vmem>>, %arg3: memref<1x128xf32, #tpu.memory_space<vmem>>, %arg4: memref<16x128xf32, #tpu.memory_space<vmem>>) attributes {dimension_semantics = [#tpu.dimension_semantics<parallel>], iteration_bounds = array<i64: 1>, scalar_prefetch = 0 : i64, scratch_operands = 0 : i64, tpu.core_type = #tpu.core_type<tc>, window_params = [{transform_indices = @transform_0, window_bounds = array<i64: 16, 128>}, {pipeline_mode = #tpu.pipeline_mode<synchronous>, transform_indices = @transform_1, window_bounds = array<i64: 128, 128>}, {pipeline_mode = #tpu.pipeline_mode<synchronous>, transform_indices = @transform_2, window_bounds = array<i64: 1, 128>}, {transform_indices = @transform_3, window_bounds = array<i64: 16, 128>}]} {
    %c0 = arith.constant 0 : index
    %c0_0 = arith.constant 0 : index
    %0 = vector.load %arg1[%c0, %c0_0] : memref<16x128xbf16, #tpu.memory_space<vmem>>, vector<16x128xbf16>
    %c0_1 = arith.constant 0 : index
    %c0_2 = arith.constant 0 : index
    %1 = vector.load %arg2[%c0_1, %c0_2] : memref<128x128xbf16, #tpu.memory_space<vmem>>, vector<128x128xbf16>
    %cst = arith.constant dense<0.000000e+00> : vector<16x128xf32>
    %2 = tpu.matmul %0, %1, %cst {dimension_numbers = #tpu.dot_dimension_numbers<[1], [0], [0], [1], [0, 0, 1, 1], [], []>} : vector<16x128xbf16>, vector<128x128xbf16>, vector<16x128xf32> -> vector<16x128xf32>
    %c0_3 = arith.constant 0 : index
    %c0_4 = arith.constant 0 : index
    %3 = vector.load %arg3[%c0_3, %c0_4] : memref<1x128xf32, #tpu.memory_space<vmem>>, vector<1x128xf32>
    %4 = vector.broadcast %3 : vector<1x128xf32> to vector<16x128xf32>
    %5 = arith.addf %2, %4 : vector<16x128xf32>
    %c0_5 = arith.constant 0 : index
    %c0_6 = arith.constant 0 : index
    %6 = vector.load %arg4[%c0_5, %c0_6] : memref<16x128xf32, #tpu.memory_space<vmem>>, vector<16x128xf32>
    tpu.vector_store %arg4[%c0_5, %c0_6], %5 {strides = array<i32>} : memref<16x128xf32, #tpu.memory_space<vmem>>, vector<16x128xf32>,
    return
  }
  func.func @transform_0(%arg0: i32) -> (i32, i32) {
    %c0_i32 = arith.constant 0 : i32
    %c0_i32_0 = arith.constant 0 : i32
    return %arg0, %c0_i32 : i32, i32
  }
  func.func @transform_1(%arg0: i32) -> (i32, i32) {
    %c0_i32 = arith.constant 0 : i32
    %c0_i32_0 = arith.constant 0 : i32
    %c0_i32_1 = arith.constant 0 : i32
    return %c0_i32, %c0_i32_0 : i32, i32
  }
  func.func @transform_2(%arg0: i32) -> (i32, i32) {
    %c0_i32 = arith.constant 0 : i32
    %c0_i32_0 = arith.constant 0 : i32
    %c0_i32_1 = arith.constant 0 : i32
    return %c0_i32, %c0_i32_0 : i32, i32
  }
  func.func @transform_3(%arg0: i32) -> (i32, i32) {
    %c0_i32 = arith.constant 0 : i32
    %c0_i32_0 = arith.constant 0 : i32
    return %arg0, %c0_i32 : i32, i32
  }
}

</mosaic_0001>

<bundles_post_ra>
// kernel: linear_forward.1
= control target key start
LH: loop header
LB: loop body
LE: loop exit
PB: predicated region body
PF: predicated region fallthrough
CT: control target
= control target key end

     0   :  { %v191_v0 = vmov 0.0   ;;  %vm192_vm0 = vmmov 0   ;;  %s249_s1 = inlined_call_operand.vmem [shape: bf16[128,128], index: 1, kind: input, shape index: {}]   ;;  %s250_s0 = inlined_call_operand.vmem [shape: bf16[16,128], index: 0, kind: input, shape index: {}]   ;;  %s251_s2 = inlined_call_operand.vmem [shape: f32[1,128], index: 2, kind: input, shape index: {}]   ;;  %s252_s3 = inlined_call_operand.vmem [shape: f32[16,128], index: 3, kind: output, shape index: {}]  }
   0x1   :  { %160 = vmatprep.subr.bf16.mxu0 %v191_v0  ;;  %v182_v1 = vld [vmem:[%s249_s1] sm:$0xff]   ;;  %176 = vmatprep.mubr.msk.bf16.mxu0 %vm192_vm0, %v191_v0  ;;  %v183_v2 = vld [vmem:[%s249_s1 + $0x8] sm:$0xff]   ;;  %v184_v3 = vld [vmem:[%s249_s1 + $0x10] sm:$0xff]  }
   0x2   :  { %161 = vmatpush3.bf16.msra.mxu0 %v182_v1  ;;  %v185_v4 = vld [vmem:[%s249_s1 + $0x18] sm:$0xff]   ;;  %v186_v5 = vld [vmem:[%s249_s1 + $0x20] sm:$0xff]   ;;  %v187_v6 = vld [vmem:[%s249_s1 + $0x28] sm:$0xff]  }
   0x3   :  { %162 = vmatprep.subr.bf16.mxu0 %v191_v0  ;;  %v188_v7 = vld [vmem:[%s249_s1 + $0x30] sm:$0xff]   ;;  %v189_v8 = vld [vmem:[%s249_s1 + $0x38] sm:$0xff]   ;;  %v190_v9 = vld [vmem:[%s250_s0] sm:$0xff]  }
   0x4   :  { %v141_v10 = vld [vmem:[%s251_s2] ss:$0 sm:$0xff] }
   0x6   :  { %163 = vmatpush3.bf16.msra.mxu0 %v183_v2 }
   0x7   :  { %164 = vmatprep.subr.bf16.mxu0 %v191_v0 }
   0xa   :  { %165 = vmatpush3.bf16.msra.mxu0 %v184_v3 }
   0xb   :  { %166 = vmatprep.subr.bf16.mxu0 %v191_v0 }
   0xe   :  { %167 = vmatpush3.bf16.msra.mxu0 %v185_v4 }
   0xf   :  { %168 = vmatprep.subr.bf16.mxu0 %v191_v0 }
  0x12   :  { %169 = vmatpush3.bf16.msra.mxu0 %v186_v5 }
  0x13   :  { %170 = vmatprep.subr.bf16.mxu0 %v191_v0 }
  0x16   :  { %171 = vmatpush3.bf16.msra.mxu0 %v187_v6 }
  0x17   :  { %172 = vmatprep.subr.bf16.mxu0 %v191_v0 }
  0x1a   :  { %173 = vmatpush3.bf16.msra.mxu0 %v188_v7 }
  0x1b   :  { %174 = vmatprep.subr.bf16.mxu0 %v191_v0 }
  0x1e   :  { %175 = vmatpush3.bf16.msra.mxu0 %v189_v8 }
  0x21   :  { %177 = vmatmul.mubr.bf16.vlgmr.msra.gmra.mrb[0].mxu0 %v190_v9 }
  0xf4   :  { %v128_v11 = vpop.f32.mrb[0].mxu0 }
  0xf5   :  { %v129_v12 = vadd.f32 %v141_v10, %v128_v11  ;;  %v178_v13 = vpop.f32.mrb[1].mxu0 }
  0xf6   :  { %v131_v14 = vpop.f32.mrb[2].mxu0 }
  0xf7   :  { %135 = vst [vmem:[%s252_s3] sm:$0xff] %v129_v12  ;;  %v132_v15 = vadd.f32 %v141_v10, %v131_v14  ;;  %v179_v16 = vpop.f32.mrb[3].mxu0 }
  0xf9   :  { %136 = vst [vmem:[%s252_s3 + $0x8] sm:$0xff] %v132_v15 }

</bundles_post_ra>
